<compile_context>
chip_gen: v7x
topology: tpu7x:2x2x1
jax: 0.10.0
libtpu: 0.0.40
codegen_flags: <defaults>
</compile_context>

<pallas_src>
import functools

import jax
import jax.numpy as jnp
from jax.experimental import pallas as pl
from jax.experimental.pallas import tpu as pltpu


def _round_up(x, m):
    return ((x + m - 1) // m) * m


def _tpu_vmem_capacity_bytes():
    """Physical VMEM of the current chip; conservative (v7x = 64 MiB) fallback."""
    try:
        return int(pltpu.get_tpu_info().vmem_capacity_bytes)
    except Exception:
        return 64 << 20


def _ffn_accumulate(x_ref, w1_ref, w3_ref, w2_ref, acc_ref, compute_dtype):
    """acc += (silu(x @ W1t_h) * (x @ W3t_h)) @ W2t_h for one hidden tile.

    Weights arrive pre-transposed (w1t/w3t: [D, H], w2t: [H, D]) so all three
    contractions are standard [M,K]x[K,N] -- the MXU sees the contraction on
    the RHS sublane axis and no per-step layout changes are required.
    """
    x = x_ref[...].astype(compute_dtype)                              # in-kernel cast (VPU)
    h1 = jnp.dot(x, w1_ref[...], preferred_element_type=jnp.float32)  # (tm, th)
    h3 = jnp.dot(x, w3_ref[...], preferred_element_type=jnp.float32)  # (tm, th)
    gated = h1 * jax.nn.sigmoid(h1) * h3                              # f32 SiLU gate
    acc_ref[...] += jnp.dot(gated.astype(w2_ref.dtype), w2_ref[...],
                            preferred_element_type=jnp.float32)       # (tm, D)


def _ffn_kernel_f32_out(x_ref, w1_ref, w3_ref, w2_ref, o_ref, *, compute_dtype):
    # f32 output block doubles as the accumulator (resident across the H axis).
    @pl.when(pl.program_id(1) == 0)
    def _():
        o_ref[...] = jnp.zeros_like(o_ref)

    _ffn_accumulate(x_ref, w1_ref, w3_ref, w2_ref, o_ref, compute_dtype)


def _ffn_kernel_scratch(x_ref, w1_ref, w3_ref, w2_ref, o_ref, acc_ref, *, compute_dtype):
    @pl.when(pl.program_id(1) == 0)
    def _():
        acc_ref[...] = jnp.zeros_like(acc_ref)

    _ffn_accumulate(x_ref, w1_ref, w3_ref, w2_ref, acc_ref, compute_dtype)

    @pl.when(pl.program_id(1) == pl.num_programs(1) - 1)
    def _():
        o_ref[...] = acc_ref[...].astype(o_ref.dtype)


def prepare_ffn_weights(w1, w2, w3):
    """One-time (weight-load-time) layout prep for nn.Linear weights.

    w1, w3: [H, D]; w2: [D, H]  ->  w1t, w3t: [D, H]; w2t: [H, D].
    Do this once per model load, NOT per forward call.
    """
    return w1.T, w2.T, w3.T


def feed_forward(x, w1t, w2t, w3t, *, tile_m=None, tile_h=None):
    """SwiGLU FFN: w2(silu(w1 x) * (w3 x)).

    x:   [B, S, D]  (any float dtype; cast to the weight dtype inside the kernel)
    w1t: [D, H], w2t: [H, D], w3t: [D, H]  (from prepare_ffn_weights)
    """
    B, S, D = x.shape
    D1, H = w1t.shape
    assert D1 == D and w3t.shape == (D, H) and w2t.shape == (H, D)
    assert D % 128 == 0, "model dim must be a multiple of 128"

    out_dtype = x.dtype
    compute_dtype = w1t.dtype       # run MXU matmuls in the weight dtype (bf16 ideal)
    M = B * S
    vmem_cap = _tpu_vmem_capacity_bytes()

    # ---- hidden-axis tile ----------------------------------------------------
    if tile_h is None:
        tile_h = 256                # keep the w2 matmul's K >= 256 (MXU push amortization)
    tile_h = min(tile_h, H)
    assert H % tile_h == 0 and tile_h % 128 == 0

    # ---- token-axis tile (weight-streaming roofline) ---------------------------
    # Weights are re-streamed from HBM once per M-tile; arithmetic intensity of
    # the inner loop is ~tile_m flops per weight byte.  MXU-bound thresholds:
    # ~240 (v5e), ~650 (v6e), ~310 per TC (v7x).  Choose by VMEM generation:
    # 128-MiB parts (v5e/v6e) -> 1024, 64-MiB parts (v7x) -> 512.
    if tile_m is None:
        tile_m = 1024 if vmem_cap >= (96 << 20) else 512
    tile_m = max(16, min(tile_m, _round_up(M, 16)))   # multiple of 16 (bf16 sublanes)
    tile_m = _round_up(tile_m, 16)

    acc_in_out = (out_dtype == jnp.float32)

    x_bytes = jnp.dtype(x.dtype).itemsize
    w_bytes = jnp.dtype(compute_dtype).itemsize
    o_bytes = jnp.dtype(out_dtype).itemsize

    def footprint(tm, th):
        return (2 * tm * D * x_bytes                       # x tiles (double-buffered)
                + 2 * 3 * D * th * w_bytes                 # w1t/w3t/w2t tiles (double-buffered)
                + 2 * tm * D * o_bytes                     # output tiles (resident across H)
                + (0 if acc_in_out else tm * D * 4)        # f32 scratch accumulator
                + tm * D * w_bytes                         # in-kernel cast copy of x
                + 3 * tm * th * 4)                         # f32 h1 / h3 / gated intermediates

    # Leave ~16 MiB headroom for Mosaic internal scratch; never cap below 32 MiB.
    budget = max(vmem_cap - (16 << 20), 32 << 20)
    # Shrink tile_m first (never tile_h) if the footprint over-asks VMEM.
    while tile_m > 128 and int(footprint(tile_m, tile_h) * 1.1) > budget:
        tile_m = max(128, _round_up(tile_m // 2, 16))

    m_pad = (-M) % tile_m
    Mp = M + m_pad

    xm = x.reshape(M, D)
    if m_pad:
        # Only a ragged last M-tile forces a pad copy; the dtype cast happens
        # in-kernel, so the tile-aligned common case touches x exactly once.
        xm = jnp.pad(xm, ((0, m_pad), (0, 0)))

    kernel = (functools.partial(_ffn_kernel_f32_out, compute_dtype=compute_dtype)
              if acc_in_out else
              functools.partial(_ffn_kernel_scratch, compute_dtype=compute_dtype))
    scratch = [] if acc_in_out else [pltpu.VMEM((tile_m, D), jnp.float32)]

    vmem_limit = min(max(int(footprint(tile_m, tile_h) * 1.1) + (2 << 20), 32 << 20),
                     budget)

    # TODO(synk): decode-regime (single M-tile) path: split H across the two v7x
    # cores with a cross-core partial-sum combine, and/or int8 (v5e/v6e) / fp8
    # (v7x) weight streaming with per-channel scales in the f32 gate path.
    out = pl.pallas_call(
        kernel,
        out_shape=jax.ShapeDtypeStruct((Mp, D), out_dtype),
        grid_spec=pltpu.PrefetchScalarGridSpec(
            num_scalar_prefetch=0,
            grid=(Mp // tile_m, H // tile_h),                 # reduction (H) axis last
            in_specs=[
                pl.BlockSpec((tile_m, D), lambda i, h: (i, 0)),   # x tile
                pl.BlockSpec((D, tile_h), lambda i, h: (0, h)),   # W1^T cols
                pl.BlockSpec((D, tile_h), lambda i, h: (0, h)),   # W3^T cols
                pl.BlockSpec((tile_h, D), lambda i, h: (h, 0)),   # W2^T rows
            ],
            out_specs=pl.BlockSpec((tile_m, D), lambda i, h: (i, 0)),
            scratch_shapes=scratch,
        ),
        compiler_params=pltpu.CompilerParams(
            dimension_semantics=("parallel", "arbitrary"),
            vmem_limit_bytes=vmem_limit),
    )(xm, w1t, w3t, w2t)

    if m_pad:
        out = out[:M]
    return out.reshape(B, S, D)


if __name__ == "__main__":
    # Small shapes consistent with the module's construction rule:
    # hidden_dim = multiple_of * ceil(4*dim / multiple_of)
    dim = 128
    multiple_of = 128
    hidden_dim = multiple_of * ((4 * dim + multiple_of - 1) // multiple_of)  # 512
    batch, seq = 2, 8

    key = jax.random.PRNGKey(0)
    kx, k1, k2, k3 = jax.random.split(key, 4)
    x = jax.random.normal(kx, (batch, seq, dim), dtype=jnp.float32)
    # nn.Linear weight layout (out_features, in_features), bias=False; bf16 weights.
    w1 = (jax.random.normal(k1, (hidden_dim, dim), dtype=jnp.float32) * 0.02).astype(jnp.bfloat16)
    w2 = (jax.random.normal(k2, (dim, hidden_dim), dtype=jnp.float32) * 0.02).astype(jnp.bfloat16)
    w3 = (jax.random.normal(k3, (hidden_dim, dim), dtype=jnp.float32) * 0.02).astype(jnp.bfloat16)

    # One-time layout prep (equivalent of doing it at weight-load time).
    w1t, w2t, w3t = prepare_ffn_weights(w1, w2, w3)

    # Pure-JAX f32 reference.
    xf = x.astype(jnp.float32)
    w1f, w2f, w3f = (w.astype(jnp.float32) for w in (w1, w2, w3))
    h1 = xf @ w1f.T
    ref = (jax.nn.silu(h1) * (xf @ w3f.T)) @ w2f.T

    # Path 1: f32 input/output -> accumulate directly in the output block.
    out_f32 = jax.block_until_ready(feed_forward(x, w1t, w2t, w3t))
    assert out_f32.shape == (batch, seq, dim) and out_f32.dtype == jnp.float32
    err = jnp.max(jnp.abs(out_f32 - ref)) / (jnp.max(jnp.abs(ref)) + 1e-6)
    assert err < 2e-2, f"f32-out relative error too large: {err}"

    # Path 2: bf16 input/output -> f32 VMEM scratch accumulator + final cast.
    out_bf16 = jax.block_until_ready(
        feed_forward(x.astype(jnp.bfloat16), w1t, w2t, w3t))
    assert out_bf16.shape == (batch, seq, dim) and out_bf16.dtype == jnp.bfloat16
    err2 = jnp.max(jnp.abs(out_bf16.astype(jnp.float32) - ref)) / (jnp.max(jnp.abs(ref)) + 1e-6)
    assert err2 < 3e-2, f"bf16-out relative error too large: {err2}"

    print("KERNEL_OK")
</pallas_src>

<mosaic_0001>
module attributes {stable_mosaic.version = 11 : i64} {
  func.func @_ffn_kernel_f32_out(%arg0: i32, %arg1: i32, %arg2: memref<16x128xf32, #tpu.memory_space<vmem>>, %arg3: memref<128x256xbf16, #tpu.memory_space<vmem>>, %arg4: memref<128x256xbf16, #tpu.memory_space<vmem>>, %arg5: memref<256x128xbf16, #tpu.memory_space<vmem>>, %arg6: memref<16x128xf32, #tpu.memory_space<vmem>>) attributes {dimension_semantics = [#tpu.dimension_semantics<parallel>, #tpu.dimension_semantics<arbitrary>], iteration_bounds = array<i64: 1, 2>, scalar_prefetch = 0 : i64, scratch_operands = 0 : i64, tpu.core_type = #tpu.core_type<tc>, window_params = [{transform_indices = @transform_0, window_bounds = array<i64: 16, 128>}, {transform_indices = @transform_1, window_bounds = array<i64: 128, 256>}, {transform_indices = @transform_2, window_bounds = array<i64: 128, 256>}, {transform_indices = @transform_3, window_bounds = array<i64: 256, 128>}, {transform_indices = @transform_4, window_bounds = array<i64: 16, 128>}]} {
    %c0_i32 = arith.constant 0 : i32
    %0 = arith.cmpi eq, %arg1, %c0_i32 : i32
    %1 = arith.extui %0 : i1 to i32
    %c0_i32_0 = arith.constant 0 : i32
    %2 = arith.cmpi ne, %1, %c0_i32_0 : i32
    scf.if %2 {
      %cst_15 = arith.constant 0.000000e+00 : f32
      %22 = vector.broadcast %cst_15 : f32 to vector<16x128xf32>
      %c0_16 = arith.constant 0 : index
      %c0_17 = arith.constant 0 : index
      %23 = vector.load %arg6[%c0_16, %c0_17] : memref<16x128xf32, #tpu.memory_space<vmem>>, vector<16x128xf32>
      tpu.vector_store %arg6[%c0_16, %c0_17], %22 {strides = array<i32>} : memref<16x128xf32, #tpu.memory_space<vmem>>, vector<16x128xf32>,
    } else {
    }
    %c0 = arith.constant 0 : index
    %c0_1 = arith.constant 0 : index
    %3 = vector.load %arg2[%c0, %c0_1] : memref<16x128xf32, #tpu.memory_space<vmem>>, vector<16x128xf32>
    %4 = arith.truncf %3 : vector<16x128xf32> to vector<16x128xbf16>
    %c0_2 = arith.constant 0 : index
    %c0_3 = arith.constant 0 : index
    %5 = vector.load %arg3[%c0_2, %c0_3] : memref<128x256xbf16, #tpu.memory_space<vmem>>, vector<128x256xbf16>
    %cst = arith.constant dense<0.000000e+00> : vector<16x256xf32>
    %6 = tpu.matmul %4, %5, %cst {dimension_numbers = #tpu.dot_dimension_numbers<[1], [0], [0], [1], [0, 0, 1, 1], [], []>} : vector<16x128xbf16>, vector<128x256xbf16>, vector<16x256xf32> -> vector<16x256xf32>
    %c0_4 = arith.constant 0 : index
    %c0_5 = arith.constant 0 : index
    %7 = vector.load %arg4[%c0_4, %c0_5] : memref<128x256xbf16, #tpu.memory_space<vmem>>, vector<128x256xbf16>
    %cst_6 = arith.constant dense<0.000000e+00> : vector<16x256xf32>
    %8 = tpu.matmul %4, %7, %cst_6 {dimension_numbers = #tpu.dot_dimension_numbers<[1], [0], [0], [1], [0, 0, 1, 1], [], []>} : vector<16x128xbf16>, vector<128x256xbf16>, vector<16x256xf32> -> vector<16x256xf32>
    %9 = arith.negf %6 : vector<16x256xf32>
    %10 = math.exp %9 : vector<16x256xf32>
    %cst_7 = arith.constant 1.000000e+00 : f32
    %11 = vector.broadcast %cst_7 : f32 to vector<16x256xf32>
    %12 = arith.addf %11, %10 : vector<16x256xf32>
    %13 = arith.divf %11, %12 : vector<16x256xf32>
    %14 = arith.mulf %6, %13 : vector<16x256xf32>
    %15 = arith.mulf %14, %8 : vector<16x256xf32>
    %c0_8 = arith.constant 0 : index
    %c0_9 = arith.constant 0 : index
    %16 = vector.load %arg6[%c0_8, %c0_9] : memref<16x128xf32, #tpu.memory_space<vmem>>, vector<16x128xf32>
    %17 = arith.truncf %15 : vector<16x256xf32> to vector<16x256xbf16>
    %c0_10 = arith.constant 0 : index
    %c0_11 = arith.constant 0 : index
    %18 = vector.load %arg5[%c0_10, %c0_11] : memref<256x128xbf16, #tpu.memory_space<vmem>>, vector<256x128xbf16>
    %cst_12 = arith.constant dense<0.000000e+00> : vector<16x128xf32>
    %19 = tpu.matmul %17, %18, %cst_12 {dimension_numbers = #tpu.dot_dimension_numbers<[1], [0], [0], [1], [0, 0, 1, 1], [], []>} : vector<16x256xbf16>, vector<256x128xbf16>, vector<16x128xf32> -> vector<16x128xf32>
    %20 = arith.addf %16, %19 : vector<16x128xf32>
    %c0_13 = arith.constant 0 : index
    %c0_14 = arith.constant 0 : index
    %21 = vector.load %arg6[%c0_13, %c0_14] : memref<16x128xf32, #tpu.memory_space<vmem>>, vector<16x128xf32>
    tpu.vector_store %arg6[%c0_13, %c0_14], %20 {strides = array<i32>} : memref<16x128xf32, #tpu.memory_space<vmem>>, vector<16x128xf32>,
    return
  }
  func.func @transform_0(%arg0: i32, %arg1: i32) -> (i32, i32) {
    %c0_i32 = arith.constant 0 : i32
    %c0_i32_0 = arith.constant 0 : i32
    return %arg0, %c0_i32 : i32, i32
  }
  func.func @transform_1(%arg0: i32, %arg1: i32) -> (i32, i32) {
    %c0_i32 = arith.constant 0 : i32
    %c0_i32_0 = arith.constant 0 : i32
    return %c0_i32, %arg1 : i32, i32
  }
  func.func @transform_2(%arg0: i32, %arg1: i32) -> (i32, i32) {
    %c0_i32 = arith.constant 0 : i32
    %c0_i32_0 = arith.constant 0 : i32
    return %c0_i32, %arg1 : i32, i32
  }
  func.func @transform_3(%arg0: i32, %arg1: i32) -> (i32, i32) {
    %c0_i32 = arith.constant 0 : i32
    %c0_i32_0 = arith.constant 0 : i32
    return %arg1, %c0_i32 : i32, i32
  }
  func.func @transform_4(%arg0: i32, %arg1: i32) -> (i32, i32) {
    %c0_i32 = arith.constant 0 : i32
    %c0_i32_0 = arith.constant 0 : i32
    return %arg0, %c0_i32 : i32, i32
  }
}

</mosaic_0001>

<bundles_post_ra>
// kernel: tpu_custom_call.1
= control target key start
LH: loop header
LB: loop body
LE: loop exit
PB: predicated region body
PF: predicated region fallthrough
CT: control target
= control target key end

     0   :  { %s1805_s0 = inlined_call_operand.hbm [shape: f32[16,128], index: 0, kind: input, shape index: {}]   ;;  %s1806_s1 = inlined_call_operand.hbm [shape: bf16[128,512], index: 1, kind: input, shape index: {}]   ;;  %s1807_s2 = inlined_call_operand.hbm [shape: bf16[128,512], index: 2, kind: input, shape index: {}]   ;;  %s1808_s3 = inlined_call_operand.hbm [shape: bf16[512,128], index: 3, kind: input, shape index: {}]   ;;  %s1809_s4 = inlined_call_operand.hbm [shape: f32[16,128], index: 4, kind: output, shape index: {}]  }
   0x1   :  { %1821 = sst [smem:[#allocation15_spill]] %s1806_s1 }
   0x2   :  { %1822 = sst [smem:[#allocation16_spill]] %s1807_s2 }
   0x3   :  { %9 = vsyncpa [#allocation3], 0 }
   0x4   :  { %10 = vsyncpa [#allocation6], 0 }
   0x5   :  { %12 = vsyncpa [#allocation6 + $0x1], 0 }
   0x6   :  { %13 = vsyncpa [#allocation9], 0 }
   0x7   :  { %15 = vsyncpa [#allocation9 + $0x1], 0 }
   0x8   :  { %16 = vsyncpa [#allocation4], 0  ;;  %s1472_s15 = smov 0   ;;  %s1474_s16 = smov 0  }
   0x9   :  { %s1476_s17 = smov 0   ;;  %s1478_s18 = smov 0  }
   0xa   :  { %s1480_s19 = smov 0   ;;  %s1482_s20 = smov 0  }
   0xb LB: > { %s31_s21 = sadd.s32 1, %s1427_s19  ;;  %s67_s22 = sadd.s32 1, %s1419_s17  ;;  %s1431_s20 = sphi %s1482_s20, %s22_s20   ;;  %s1427_s19 = sphi %s1480_s19, %s1845_s19   ;;  %s1423_s18 = sphi %s1478_s18, %s1844_s18   ;;  %s1419_s17 = sphi %s1476_s17, %s1843_s17   ;;  %s1415_s16 = sphi %s1474_s16, %s1842_s16   ;;  %s1411_s15 = sphi %s1472_s15, %s1841_s15  }
   0xc   : > { %p32_p0 = scmp.ge.s32.totalorder %s31_s21, 2  ;;  %p74_p1 = scmp.ne.s32.totalorder %s1419_s17, %s1415_s16 }
   0xd   : > { %p75_p2 = scmp.eq.s32.totalorder %s1431_s20, 0  ;;  %p1082_p5 = scmp.lt.s32.totalorder %s1431_s20, 2 }
   0xe   : > { %s1847_s21 = smov (%p32_p0, %s31_s21), 0  ;;  %s198_s25 = sand.u32 1, %s1431_s20  }
   0xf   : > { %p1509_p3 = por %p75_p2, %p74_p1  ;;  %s64_s24 = ssub.s32 %s1427_s19, %s1847_s21 }
  0x10   : > { %p65_p4 = scmp.eq.s32.totalorder %s64_s24, 0  ;;  %s1810_s26 = sand.u32 1, %s1419_s17  }
  0x11   : > { %s1523_s28 = sshll.u32 %s1810_s26, 7  ;;  %s1028_s29 = sshll.u32 %s1427_s19, 7 }
  0x12   : > { %s1519_s27 = scalar_select %p65_p4, %s1419_s17, %s67_s22  }
  0x13   : > { %s1824_s1 = sld [smem:[#allocation15_spill]]  ;;  %s202_s7 = scalar_lea.vmem [#allocation5], %s1523_s28 }
  0x14   : > { %s209_s8 = sshll.u32 %s202_s7, 4  ;;  %p1536_p6 = pnand %p1082_p5, %p1509_p3  ;;  %s1532_s8 = int_to_ptr.vmem [resolvable:$true] %s209_s8 }
  0x15   : > { %s1826_s2 = sld [smem:[#allocation16_spill]]  ;;  %s1545_s13 = scalar_lea.sflag [#allocation6], %s198_s25 }
  0x16   : > { %s1825_s9 = scalar_select %p1536_p6, 1, 0 }
  0x17   : > { %p1551_p8 = pneg %p1536_p6 }
  0x19   : > { %s1529_s6 = scalar_lea.hbm %s1824_s1, %s1028_s29  ;;  %s1230_s30 = scalar_lea.hbm %s1824_s1, 4096 }
  0x1a   : > { %s1225_s14 = scalar_lea.hbm %s1529_s6, 2048  ;;  %p1231_p11 = scmp.lt.u32.totalorder %s1529_s6, %s1824_s1 }
  0x1b   : > { %s1543_s12 = scalar_lea.hbm %s1826_s2, %s1028_s29  ;;  %p1226_p7 = scmp.ne.s32.totalorder %s1529_s6, %s1225_s14 }
  0x1c   : > { %s1827_s22 = scalar_select %p1551_p8, 1, 0 }
  0x1d   : > { %p1228_p9 = pnand %p1551_p8, %p1226_p7  ;;  %p1232_p12 = scmp.lt.u32.totalorder %s1230_s30, %s1225_s14 }
  0x1e   : > { %p1234_p0 = scmp.lt.u32.totalorder %s1225_s14, %s1529_s6 }
  0x1f   : > { %p1229_p10 = pneg %p1228_p9  ;;  %p1233_p13 = por %p1232_p12, %p1231_p11 }
  0x21   : > { %p1235_p1 = por %p1234_p0, %p1233_p13 }
  0x23   : > { %p1236_p2 = pnand %p1235_p1, %p1229_p10 }
  0x25   : > { %1239 = shalt.err (!%p1236_p2)
}
  0x26   : > { %s1240_s25 = scalar_lea.vmem %s1532_s8, 2048  ;;  %s1433_s7 = smov [#allocation5]  }
  0x27   : > { %p1241_p3 = scmp.ne.s32.totalorder %s1532_s8, %s1240_s25  ;;  %s1245_s10 = sshll.u32 %s1433_s7, 4  ;;  %s1246_s10 = int_to_ptr.vmem [resolvable:$false] %s1245_s10 }
  0x28   : > { %s1247_s11 = scalar_lea.vmem %s1246_s10, 4096  ;;  %p1248_p7 = scmp.lt.s32.totalorder %s1532_s8, %s1246_s10 }
  0x29   : > { %p1243_p4 = pnand %p1241_p3, %p1551_p8  ;;  %p1249_p9 = scmp.lt.s32.totalorder %s1247_s11, %s1240_s25 }
  0x2b   : > { %p1244_p5 = pneg %p1243_p4  ;;  %p1250_p11 = por %p1249_p9, %p1248_p7 }
  0x2d   : > { %p1251_p12 = pnand %p1250_p11, %p1244_p5 }
  0x2f   : > { %1254 = shalt.err (!%p1251_p12)
}
  0x30   : > { %s1811_s14 = smov 256   ;;  %s1812_s23 = smov 128  }
  0x31   : > { %s1436_s24 = smov 8   ;;  %s1579_s30 = sadd.s32 4294967295, %s1431_s20  }
  0x32   : > { %1074 = dma.hbm_to_vmem [thread:$0]  (!%p1536_p6), %s1529_s6, 2048, %s1532_s8, %s1545_s13, %s1811_s14, %s1812_s23, %s1436_s24  }
  0x33   : > { %p80_p10 = scmp.ne.s32.totalorder %s1415_s16, %s1411_s15  ;;  %p1814_p13 = scmp.eq.s32.totalorder %s1579_s30, 0 }
  0x34   : > { %p954_p0 = scmp.ge.s32.totalorder %s1431_s20, 1  ;;  %p169_p1 = scmp.lt.s32.totalorder %s1431_s20, 3 }
  0x35   : > { %p1588_p2 = por %p1814_p13, %p80_p10  ;;  %s1437_s8 = smov [#allocation2]  }
  0x36   : > { %p1592_p3 = pnand %p954_p0, %p169_p1  ;;  %s184_s29 = sshll.u32 %s1437_s8, 4  ;;  %s1598_s29 = int_to_ptr.vmem [resolvable:$true] %s184_s29 }
  0x37   : > { %s1828_s5 = scalar_select %p1588_p2, 1, 0 }
  0x38   : > { %s1829_s6 = scalar_select %p1592_p3, 1, 0 }
  0x39   : > { %p1067_p4 = pneg %p1592_p3  ;;  %s223_s15 = scalar_lea.vmem [#allocation7], %s1523_s28 }
  0x3a   : > { %s230_s25 = sshll.u32 %s223_s15, 4  ;;  %s1255_s10 = scalar_lea.hbm %s1543_s12, 2048  ;;  %s1607_s25 = int_to_ptr.vmem [resolvable:$true] %s230_s25 }
  0x3b   : > { %p1603_p5 = pnand %p1067_p4, %p1814_p13  ;;  %p1256_p7 = scmp.ne.s32.totalorder %s1543_s12, %s1255_s10 }
  0x3c   : > { %s1260_s26 = scalar_lea.hbm %s1826_s2, 4096  ;;  %p1261_p12 = scmp.lt.u32.totalorder %s1543_s12, %s1826_s2 }
  0x3d   : > { %s1830_s7 = scalar_select %p1603_p5, 1, 0 }
  0x3e   : > { %p1258_p9 = pnand %p1256_p7, %p1551_p8  ;;  %p1262_p10 = scmp.lt.u32.totalorder %s1260_s26, %s1255_s10 }
  0x3f   : > { %p1264_p1 = scmp.lt.u32.totalorder %s1255_s10, %s1543_s12 }
  0x40   : > { %p1259_p11 = pneg %p1258_p9  ;;  %p1263_p0 = por %p1262_p10, %p1261_p12 }
  0x42   : > { %p1265_p4 = por %p1264_p1, %p1263_p0 }
  0x44   : > { %p1266_p13 = pnand %p1265_p4, %p1259_p11 }
  0x46   : > { %1269 = shalt.err (!%p1266_p13)
}
  0x47   : > { %s1270_s15 = scalar_lea.vmem %s1607_s25, 2048  ;;  %s1438_s11 = smov [#allocation7]  }
  0x48   : > { %p1271_p7 = scmp.ne.s32.totalorder %s1607_s25, %s1270_s15  ;;  %s1275_s8 = sshll.u32 %s1438_s11, 4  ;;  %s1276_s8 = int_to_ptr.vmem [resolvable:$false] %s1275_s8 }
  0x49   : > { %s1277_s14 = scalar_lea.vmem %s1276_s8, 4096  ;;  %p1278_p3 = scmp.lt.s32.totalorder %s1607_s25, %s1276_s8 }
  0x4a   : > { %p1273_p9 = pnand %p1271_p7, %p1551_p8  ;;  %p1279_p5 = scmp.lt.s32.totalorder %s1277_s14, %s1270_s15 }
  0x4c   : > { %p1274_p2 = pneg %p1273_p9  ;;  %p1280_p12 = por %p1279_p5, %p1278_p3 }
  0x4e   : > { %p1281_p10 = pnand %p1280_p12, %p1274_p2 }
  0x50   : > { %1284 = shalt.err (!%p1281_p10)
}
  0x51   : > { %s1831_s26 = smov 128   ;;  %s1832_s23 = smov 256  }
  0x52   : > { %1077 = dma.hbm_to_vmem [thread:$0]  (!%p1536_p6), %s1543_s12, 2048, %s1607_s25, %s1545_s13, %s1832_s23, %s1831_s26, %s1436_s24  }
  0x53   : > { %s1285_s11 = scalar_lea.hbm %s1805_s0, 256  ;;  %p1833_p2 = scmp.ne.s32.totalorder %s1830_s7, 0 }
  0x54   : > { %p1286_p13 = scmp.ne.s32.totalorder %s1805_s0, %s1285_s11  ;;  %p1292_p0 = scmp.lt.u32.totalorder %s1285_s11, %s1805_s0 }
  0x55   : > { %p1287_p3 = pneg %p1833_p2 }
  0x57   : > { %p1288_p5 = pnand %p1287_p3, %p1286_p13 }
  0x59   : > { %p1289_p11 = pneg %p1288_p5 }
  0x5b   : > { %p1294_p1 = pnand %p1292_p0, %p1289_p11 }
  0x5d   : > { %1297 = shalt.err (!%p1294_p1)
}
  0x5e   : > { %s1298_s12 = scalar_lea.vmem %s1598_s29, 256  ;;  %p1306_p12 = scmp.lt.s32.totalorder %s1598_s29, %s1598_s29 }
  0x5f   : > { %p1299_p4 = scmp.ne.s32.totalorder %s1598_s29, %s1298_s12  ;;  %p1307_p10 = scmp.lt.s32.totalorder %s1298_s12, %s1298_s12 }
  0x61   : > { %p1301_p7 = pnand %p1299_p4, %p1287_p3  ;;  %p1308_p6 = por %p1307_p10, %p1306_p12 }
  0x63   : > { %p1302_p9 = pneg %p1301_p7 }
  0x65   : > { %p1309_p8 = pnand %p1308_p6, %p1302_p9 }
  0x67   : > { %1312 = shalt.err (!%p1309_p8)
}
  0x68   : > { %1070 = dma.hbm_to_vmem [thread:$0]  (!%p1833_p2), %s1805_s0, 256, %s1598_s29, [#allocation3], %s1831_s26, %s1831_s26, %s1436_s24  }
  0x69   : > { %s1030_s13 = sshll.u32 %s1427_s19, 11  ;;  %s244_s25 = scalar_lea.vmem [#allocation8], %s1523_s28 }
  0x6a   : > { %s251_s23 = sshll.u32 %s244_s25, 4  ;;  %s1663_s8 = scalar_lea.hbm %s1808_s3, %s1030_s13  ;;  %s1665_s23 = int_to_ptr.vmem [resolvable:$true] %s251_s23 }
  0x6b   : > { %s1834_s7 = sand.u32 1, %s1419_s17   ;;  %s1313_s14 = scalar_lea.hbm %s1663_s8, 2048 }
  0x6c   : > { %s1669_s15 = scalar_lea.sflag [#allocation9], %s1834_s7  ;;  %p1314_p6 = scmp.ne.s32.totalorder %s1663_s8, %s1313_s14 }
  0x6d   : > { %p1835_p8 = scmp.ne.s32.totalorder %s1827_s22, 0  ;;  %s1318_s29 = scalar_lea.hbm %s1808_s3, 4096 }
  0x6e   : > { %p1319_p3 = scmp.lt.u32.totalorder %s1663_s8, %s1808_s3  ;;  %p1320_p5 = scmp.lt.u32.totalorder %s1318_s29, %s1313_s14 }
  0x6f   : > { %p1316_p13 = pnand %p1314_p6, %p1835_p8  ;;  %p1322_p0 = scmp.lt.u32.totalorder %s1313_s14, %s1663_s8 }
  0x70   : > { %p1321_p11 = por %p1320_p5, %p1319_p3 }
  0x71   : > { %p1317_p2 = pneg %p1316_p13 }
  0x72   : > { %p1323_p1 = por %p1322_p0, %p1321_p11 }
  0x74   : > { %p1324_p4 = pnand %p1323_p1, %p1317_p2 }
  0x76   : > { %1327 = shalt.err (!%p1324_p4)
}
  0x77   : > { %s1328_s1 = scalar_lea.vmem %s1665_s23, 2048  ;;  %s1439_s2 = smov [#allocation8]  }
  0x78   : > { %p1329_p7 = scmp.ne.s32.totalorder %s1665_s23, %s1328_s1  ;;  %s1333_s13 = sshll.u32 %s1439_s2, 4  ;;  %s1334_s13 = int_to_ptr.vmem [resolvable:$false] %s1333_s13 }
  0x79   : > { %s1335_s25 = scalar_lea.vmem %s1334_s13, 4096  ;;  %p1336_p10 = scmp.lt.s32.totalorder %s1665_s23, %s1334_s13 }
  0x7a   : > { %p1331_p9 = pnand %p1329_p7, %p1835_p8  ;;  %p1337_p6 = scmp.lt.s32.totalorder %s1335_s25, %s1328_s1 }
  0x7c   : > { %p1332_p12 = pneg %p1331_p9  ;;  %p1338_p13 = por %p1337_p6, %p1336_p10 }
  0x7e   : > { %p1339_p3 = pnand %p1338_p13, %p1332_p12 }
  0x80   : > { %1342 = shalt.err (!%p1339_p3)
}
  0x81   : > { %s1440_s10 = smov 64   ;;  %s1441_s11 = smov 4  }
  0x82   : > { %p1836_p2 = scmp.ne.s32.totalorder %s1825_s9, 0  ;;  %p1837_p8 = scmp.ne.s32.totalorder %s1829_s6, 0 }
  0x83   : > { %p1838_p5 = scmp.eq.s32.totalorder (!%p1837_p8), %s1579_s30, 0 }
  0x84   : > { %1080 = dma.hbm_to_vmem [thread:$0]  (!%p1836_p2), %s1663_s8, 2048, %s1665_s23, %s1669_s15, %s1440_s10, %s1440_s10, %s1441_s11  }
  0x85   : > { %263 = sbr.rel (%p1837_p8) target bundleno = 675 (0x2a3), region = 36 }
  0x8c   : > { %1394 = dma.done.wait (%p1838_p5), [#allocation3], 256   ;;  %p1839_p11 = pmov %p1838_p5 }
  0x8d   : > { %s269_s22 = sand.u32 1, %s1579_s30   ;;  %s271_s7 = sand.u32 1, %s1415_s16  }
  0x8e   : > { %1396 = vsyncadd (%p1839_p11), [#allocation3], 4294967040  ;;  %s968_s14 = sshll.u32 %s271_s7, 7  ;;  %s270_s28 = scalar_lea.sflag [#allocation6], %s269_s22 }
  0x8f   : > { %s1701_s24 = scalar_lea.vmem [#allocation5], %s968_s14  ;;  %p1840_p0 = scmp.ne.s32.totalorder %s1828_s5, 0 }
  0x91   : > { %1398 = dma.done.wait (%p1840_p0), %s270_s28, 4096  }
  0x92   : > { %1400 = vsyncadd (%p1840_p0), %s270_s28, 4294963200  ;;  %s1707_s9 = scalar_lea.vmem [#allocation7], %s968_s14  ;;  %s288_s6 = scalar_lea.sflag [#allocation9], %s271_s7 }
  0x93   : > { %s1709_s23 = scalar_lea.vmem [#allocation8], %s968_s14 }
  0x94   : > { %1402 = dma.done.wait (%p1840_p0), %s288_s6, 2048  }
  0x95   : > { %1404 = vsyncadd (%p1840_p0), %s288_s6, 4294965248  ;;  %p971_p1 = scmp.ne.s32.totalorder %s1423_s18, 0 }
  0x96   : > { %v1442_v0 = vmov (!%p971_p1), 0.0  }
  0x97   : > { %330 = sbr.rel (%p971_p1) target bundleno = 158 (0x9e), region = 56  ;;  %331 = vst [vmem:[#allocation10] sm:$0xff] (!%p971_p1), %v1442_v0  ;;  %332 = vst [vmem:[#allocation10 + $0x8] sm:$0xff] (!%p971_p1), %v1442_v0 }
  0x9e PF: > { %v1145_v1 = vld [vmem:[%s1701_s24 + $0x4] ss:$8 sps:$4 sm:$0xff]   ;;  %v1147_v2 = vld [vmem:[%s1701_s24] ss:$8 sps:$4 sm:$0xff]   ;;  %v1443_v3 = vmov 0   ;;  %v333_v29 = vld [vmem:[#allocation2] sm:$0xff] }
  0x9f   : > { %464 = vmatprep.mubr.bf16.mxu0 %v1443_v3  ;;  %603 = vmatprep.mubr.bf16.mxu1 %v1443_v3  ;;  %v1148_v4 = vld [vmem:[%s1701_s24 + $0x14] ss:$8 sps:$4 sm:$0xff]   ;;  %v1150_v5 = vld [vmem:[%s1701_s24 + $0x10] ss:$8 sps:$4 sm:$0xff]   ;;  %v1151_v6 = vld [vmem:[%s1701_s24 + $0x24] ss:$8 sps:$4 sm:$0xff]  }
  0xa0   : > { %432 = vmatprep.subr.bf16.mxu0 %v1145_v1  ;;  %v1153_v7 = vld [vmem:[%s1701_s24 + $0x20] ss:$8 sps:$4 sm:$0xff]   ;;  %v1154_v8 = vld [vmem:[%s1701_s24 + $0x34] ss:$8 sps:$4 sm:$0xff]   ;;  %v1166_v9 = vld [vmem:[%s1707_s9 + $0x4] ss:$8 sps:$4 sm:$0xff]  }
  0xa1   : > { %433 = vmatpush1.bf16.msra.mxu0 %v1147_v2  ;;  %v1168_v10 = vld [vmem:[%s1707_s9] ss:$8 sps:$4 sm:$0xff]   ;;  %v1156_v11 = vld [vmem:[%s1701_s24 + $0x30] ss:$8 sps:$4 sm:$0xff]   ;;  %v1157_v12 = vld [vmem:[%s1701_s24 + $0x44] ss:$8 sps:$4 sm:$0xff]   ;;  %571 = vmatprep.subr.bf16.mxu1 %v1166_v9 }
  0xa2   : > { %434 = vmatprep.subr.bf16.mxu0 %v1148_v4  ;;  %v1172_v13 = vld [vmem:[%s1707_s9 + $0x14] ss:$8 sps:$4 sm:$0xff]   ;;  %572 = vmatpush1.bf16.msra.mxu1 %v1168_v10  ;;  %v1174_v14 = vld [vmem:[%s1707_s9 + $0x10] ss:$8 sps:$4 sm:$0xff]   ;;  %v1175_v15 = vld [vmem:[%s1707_s9 + $0x24] ss:$8 sps:$4 sm:$0xff]  }
  0xa3   : > { %573 = vmatprep.subr.bf16.mxu1 %v1172_v13  ;;  %v1159_v16 = vld [vmem:[%s1701_s24 + $0x40] ss:$8 sps:$4 sm:$0xff]   ;;  %v1160_v17 = vld [vmem:[%s1701_s24 + $0x54] ss:$8 sps:$4 sm:$0xff]   ;;  %v1162_v20 = vld [vmem:[%s1701_s24 + $0x50] ss:$8 sps:$4 sm:$0xff]  }
  0xa4   : > { %v1177_v18 = vld [vmem:[%s1707_s9 + $0x20] ss:$8 sps:$4 sm:$0xff]   ;;  %v1178_v19 = vld [vmem:[%s1707_s9 + $0x34] ss:$8 sps:$4 sm:$0xff]   ;;  %v1163_v21 = vld [vmem:[%s1701_s24 + $0x64] ss:$8 sps:$4 sm:$0xff]  }
  0xa5   : > { %435 = vmatpush1.bf16.msra.mxu0 %v1150_v5  ;;  %v1165_v22 = vld [vmem:[%s1701_s24 + $0x60] ss:$8 sps:$4 sm:$0xff]   ;;  %v1180_v23 = vld [vmem:[%s1707_s9 + $0x30] ss:$8 sps:$4 sm:$0xff]   ;;  %v1181_v24 = vld [vmem:[%s1707_s9 + $0x44] ss:$8 sps:$4 sm:$0xff]  }
  0xa6   : > { %436 = vmatprep.subr.bf16.mxu0 %v1151_v6  ;;  %574 = vmatpush1.bf16.msra.mxu1 %v1174_v14  ;;  %v1169_v25 = vld [vmem:[%s1701_s24 + $0x74] ss:$8 sps:$4 sm:$0xff]   ;;  %v1183_v26 = vld [vmem:[%s1707_s9 + $0x40] ss:$8 sps:$4 sm:$0xff]   ;;  %v1171_v28 = vld [vmem:[%s1701_s24 + $0x70] ss:$8 sps:$4 sm:$0xff]  }
  0xa7   : > { %575 = vmatprep.subr.bf16.mxu1 %v1175_v15  ;;  %v1184_v27 = vld [vmem:[%s1707_s9 + $0x54] ss:$8 sps:$4 sm:$0xff]   ;;  %v1186_v31 = vld [vmem:[%s1707_s9 + $0x50] ss:$8 sps:$4 sm:$0xff]   ;;  %v1187_v32 = vld [vmem:[%s1707_s9 + $0x64] ss:$8 sps:$4 sm:$0xff]  }
  0xa8   : > { %v334_v30 = vld [vmem:[#allocation2 + $0x8] sm:$0xff]  ;;  %v1189_v34 = vld [vmem:[%s1707_s9 + $0x60] ss:$8 sps:$4 sm:$0xff]   ;;  %v1197_v41 = vld [vmem:[%s1709_s23 + $0x50] sm:$0xff]   ;;  %s1444_s18 = smov [#allocation10]   ;;  %p1084_p4 = scmp.eq.s32.totalorder %s1579_s30, 1 }
  0xa9   : > { %437 = vmatpush1.bf16.msra.mxu0 %v1153_v7  ;;  %v335_v33 = vpack.c.bf16 %v334_v30, %v333_v29  ;;  %v1190_v35 = vld [vmem:[%s1707_s9 + $0x74] ss:$8 sps:$4 sm:$0xff]   ;;  %v1192_v36 = vld [vmem:[%s1707_s9 + $0x70] ss:$8 sps:$4 sm:$0xff]   ;;  %v1193_v37 = vld [vmem:[%s1709_s23 + $0x40] sm:$0xff]   ;;  %s832_s5 = sshll.u32 %s1444_s18, 4  ;;  %s833_s5 = int_to_ptr.vmem [resolvable:$true] %s832_s5 }
  0xaa   : > { %438 = vmatprep.subr.bf16.mxu0 %v1154_v8  ;;  %576 = vmatpush1.bf16.msra.mxu1 %v1177_v18  ;;  %v1194_v38 = vld [vmem:[%s1709_s23] sm:$0xff]   ;;  %v1195_v39 = vld [vmem:[%s1709_s23 + $0x48] sm:$0xff]   ;;  %v1198_v42 = vld [vmem:[%s1709_s23 + $0x10] sm:$0xff]   ;;  %s1343_s8 = scalar_lea.vmem %s833_s5, 256  ;;  %p1350_p10 = scmp.lt.s32.totalorder %s833_s5, %s833_s5 }
  0xab   : > { %577 = vmatprep.subr.bf16.mxu1 %v1178_v19  ;;  %v1196_v40 = vld [vmem:[%s1709_s23 + $0x8] sm:$0xff]   ;;  %v1199_v43 = vld [vmem:[%s1709_s23 + $0x58] sm:$0xff]   ;;  %v1201_v45 = vld [vmem:[%s1709_s23 + $0x60] sm:$0xff]   ;;  %p1344_p7 = scmp.ne.s32.totalorder %s833_s5, %s1343_s8  ;;  %p1351_p6 = scmp.lt.s32.totalorder %s1343_s8, %s1343_s8 }
  0xac   : > { %v1200_v44 = vld [vmem:[%s1709_s23 + $0x18] sm:$0xff]   ;;  %v1202_v46 = vld [vmem:[%s1709_s23 + $0x20] sm:$0xff]   ;;  %v1203_v47 = vld [vmem:[%s1709_s23 + $0x68] sm:$0xff]  }
  0xad   : > { %439 = vmatpush1.bf16.msra.mxu0 %v1156_v11  ;;  %v1204_v48 = vld [vmem:[%s1709_s23 + $0x28] sm:$0xff]   ;;  %v1205_v49 = vld [vmem:[%s1709_s23 + $0x70] sm:$0xff]   ;;  %v1207_v51 = vld [vmem:[%s1709_s23 + $0x78] sm:$0xff]   ;;  %p1345_p9 = pnand %p1344_p7, %p1084_p4  ;;  %p1352_p13 = por %p1351_p6, %p1350_p10 }
  0xae   : > { %440 = vmatprep.subr.bf16.mxu0 %v1157_v12  ;;  %578 = vmatpush1.bf16.msra.mxu1 %v1180_v23  ;;  %v1206_v50 = vld [vmem:[%s1709_s23 + $0x30] sm:$0xff]   ;;  %v1208_v52 = vld [vmem:[%s1709_s23 + $0x38] sm:$0xff]  }
  0xaf   : > { %579 = vmatprep.subr.bf16.mxu1 %v1181_v24  ;;  %v646_v24 = vld [vmem:[#allocation10] sm:$0xff]  ;;  %p1346_p12 = pneg %p1345_p9 }
  0xb1   : > { %441 = vmatpush1.bf16.msra.mxu0 %v1159_v16  ;;  %p1353_p3 = pnand %p1352_p13, %p1346_p12 }
  0xb2   : > { %442 = vmatprep.subr.bf16.mxu0 %v1160_v17  ;;  %580 = vmatpush1.bf16.msra.mxu1 %v1183_v26 }
  0xb3   : > { %581 = vmatprep.subr.bf16.mxu1 %v1184_v27 }
  0xb5   : > { %443 = vmatpush1.bf16.msra.mxu0 %v1162_v20 }
  0xb6   : > { %444 = vmatprep.subr.bf16.mxu0 %v1163_v21  ;;  %582 = vmatpush1.bf16.msra.mxu1 %v1186_v31 }
  0xb7   : > { %583 = vmatprep.subr.bf16.mxu1 %v1187_v32 }
  0xb9   : > { %445 = vmatpush1.bf16.msra.mxu0 %v1165_v22 }
  0xba   : > { %446 = vmatprep.subr.bf16.mxu0 %v1169_v25  ;;  %584 = vmatpush1.bf16.msra.mxu1 %v1189_v34 }
  0xbb   : > { %585 = vmatprep.subr.bf16.mxu1 %v1190_v35 }
  0xbd   : > { %447 = vmatpush1.bf16.msra.mxu0 %v1171_v28  ;;  %v647_v28 = vld [vmem:[#allocation10 + $0x8] sm:$0xff] }
  0xbe   : > { %586 = vmatpush1.bf16.msra.mxu1 %v1192_v36  ;;  %1031 = vmatprep.subr.bf16.mxu0 %v1193_v37 }
  0xc0   : > { %465 = vmatmul.mubr.bf16.vlgmr.msra.gmra.mrb[0].mxu0 %v335_v33 }
  0xc1   : > { %604 = vmatmul.mubr.bf16.vlgmr.msra.gmra.mrb[0].mxu1 %v335_v33  ;;  %1032 = vmatpush3.bf16.msra.mxu0 %v1194_v38 }
  0xc2   : > { %1033 = vmatprep.subr.bf16.mxu0 %v1195_v39 }
  0xc5   : > { %1034 = vmatpush3.bf16.msra.mxu0 %v1196_v40 }
  0xc6   : > { %1035 = vmatprep.subr.bf16.mxu0 %v1197_v41 }
  0xc9   : > { %1036 = vmatpush3.bf16.msra.mxu0 %v1198_v42 }
  0xca   : > { %1037 = vmatprep.subr.bf16.mxu0 %v1199_v43 }
  0xcd   : > { %1038 = vmatpush3.bf16.msra.mxu0 %v1200_v44 }
  0xce   : > { %1039 = vmatprep.subr.bf16.mxu0 %v1201_v45 }
  0xd1   : > { %1040 = vmatpush3.bf16.msra.mxu0 %v1202_v46 }
  0xd2   : > { %1041 = vmatprep.subr.bf16.mxu0 %v1203_v47 }
  0xd5   : > { %1042 = vmatpush3.bf16.msra.mxu0 %v1204_v48 }
  0xd6   : > { %1043 = vmatprep.subr.bf16.mxu0 %v1205_v49 }
  0xd9   : > { %1044 = vmatpush3.bf16.msra.mxu0 %v1206_v50 }
  0xda   : > { %1045 = vmatprep.subr.bf16.mxu0 %v1207_v51 }
  0xdd   : > { %1046 = vmatpush3.bf16.msra.mxu0 %v1208_v52 }
 0x193   : > { %v466_v53 = vpop.f32.mrb[0].mxu0 }
 0x194   : > { %v1004_v54 = vmul.f32 -1.442695, %v466_v53  ;;  %v468_v55 = vpop.f32.mrb[1].mxu0  ;;  %v605_v61 = vpop.f32.mrb[0].mxu1 }
 0x195   : > { %v1005_v56 = vmul.f32 -1.442695, %v468_v55  ;;  %v470_v57 = vpop.f32.mrb[2].mxu0  ;;  %v607_v62 = vpop.f32.mrb[1].mxu1 }
 0x196   : > { %1209 = vpow2.f32 %v1004_v54  ;;  %v1006_v58 = vmul.f32 -1.442695, %v470_v57  ;;  %v472_v59 = vpop.f32.mrb[3].mxu0  ;;  %v609_v63 = vpop.f32.mrb[2].mxu1 }
 0x197   : > { %1211 = vpow2.f32 %v1005_v56  ;;  %v1007_v60 = vmul.f32 -1.442695, %v472_v59  ;;  %v611_v1 = vpop.f32.mrb[3].mxu1 }
 0x198   : > { %1213 = vpow2.f32 %v1006_v58 }
 0x199   : > { %1215 = vpow2.f32 %v1007_v60 }
 0x1a0   : > { %v1210_v0 = vpop.eup %1209 }
 0x1a1   : > { %v1212_v2 = vpop.eup %1211  ;;  %v626_v3 = vadd.f32 1.0, %v1210_v0 }
 0x1a2   : > { %v1214_v4 = vpop.eup %1213  ;;  %v627_v5 = vadd.f32 1.0, %v1212_v2 }
 0x1a3   : > { %v1216_v6 = vpop.eup %1215  ;;  %1217 = vrcp.f32 %v626_v3  ;;  %v628_v7 = vadd.f32 1.0, %v1214_v4 }
 0x1a4   : > { %1219 = vrcp.f32 %v627_v5  ;;  %v629_v8 = vadd.f32 1.0, %v1216_v6 }
 0x1a5   : > { %1221 = vrcp.f32 %v628_v7 }
 0x1a6   : > { %1223 = vrcp.f32 %v629_v8 }
 0x1ad   : > { %v1218_v9 = vpop.eup %1217 }
 0x1ae   : > { %v1220_v10 = vpop.eup %1219  ;;  %v638_v11 = vmul.f32 %v1218_v9, %v466_v53 }
 0x1af   : > { %v1222_v12 = vpop.eup %1221  ;;  %v639_v13 = vmul.f32 %v1220_v10, %v468_v55 }
 0x1b0   : > { %v1224_v14 = vpop.eup %1223  ;;  %v640_v15 = vmul.f32 %v1222_v12, %v470_v57  ;;  %v642_v16 = vmul.f32 %v638_v11, %v605_v61 }
 0x1b1   : > { %v641_v17 = vmul.f32 %v1224_v14, %v472_v59  ;;  %v643_v18 = vmul.f32 %v639_v13, %v607_v62 }
 0x1b2   : > { %v644_v19 = vmul.f32 %v640_v15, %v609_v63 }
 0x1b3   : > { %v645_v20 = vmul.f32 %v641_v17, %v611_v1 }
 0x1b4   : > { %v648_v21 = vpack.c.bf16 %v644_v19, %v642_v16 }
 0x1b5   : > { %v649_v22 = vpack.c.bf16 %v645_v20, %v643_v18 }
 0x1b7   : > { %810 = vmatprep.mubr.bf16.mxu0 %v649_v22 }
 0x1b8   : > { %811 = vmatmul.mubr.bf16.vlgmr.msra.gmra.mrb[4].mxu0 %v648_v21 }
 0x28b   : > { %v1047_v23 = vpop.f32.mrb[4].mxu0 }
 0x28c   : > { %v1048_v25 = vpop.f32.mrb[5].mxu0 }
 0x28d   : > { %v1049_v26 = vadd.f32 %v1048_v25, %v1047_v23  ;;  %v1050_v27 = vpop.f32.mrb[6].mxu0 }
 0x28e   : > { %v1051_v29 = vpop.f32.mrb[7].mxu0 }
 0x28f   : > { %v819_v30 = vadd.f32 %v1049_v26, %v646_v24  ;;  %v1052_v31 = vadd.f32 %v1051_v29, %v1050_v27 }
 0x291   : > { %821 = vst [vmem:[#allocation10] sm:$0xff] %v819_v30  ;;  %v820_v32 = vadd.f32 %v1052_v31, %v647_v28 }
 0x293   : > { %822 = vst [vmem:[#allocation10 + $0x8] sm:$0xff] %v820_v32 }
 0x294   : > { %1356 = shalt.err (!%p1353_p3)
}
 0x295   : > { %s1357_s26 = scalar_lea.hbm %s1809_s4, 256 }
 0x296   : > { %p1358_p2 = scmp.ne.s32.totalorder %s1809_s4, %s1357_s26  ;;  %p1363_p11 = scmp.lt.u32.totalorder %s1357_s26, %s1809_s4 }
 0x298   : > { %p1359_p8 = pnand %p1358_p2, %p1084_p4 }
 0x29a   : > { %p1360_p5 = pneg %p1359_p8 }
 0x29c   : > { %p1365_p0 = pnand %p1363_p11, %p1360_p5 }
 0x29e   : > { %1368 = shalt.err (!%p1365_p0)
}
 0x29f   : > { %s1445_s25 = smov 128   ;;  %s1446_s10 = smov 8  }
 0x2a0   : > { %1064 = dma.vmem_to_hbm [thread:$0]  (%p1084_p4), %s833_s5, 256, %s1809_s4, [#allocation4], %s1445_s25, %s1445_s25, %s1446_s10  }
 0x2a1   : > { %1406 = dma.done.wait (%p1084_p4), [#allocation4], 256  }
 0x2a2   : > { %1408 = vsyncadd (%p1084_p4), [#allocation4], 4294967040 }
 0x2a3 PF: > { %s22_s20 = sadd.s32 1, %s1431_s20   ;;  %s1841_s15 = smov %s1415_s16 }
 0x2a4   : > { %p19_p1 = scmp.ge.s32.totalorder %s22_s20, 4   ;;  %s1842_s16 = smov %s1419_s17 }
 0x2a5   : > { %s1843_s17 = smov %s1519_s27  ;;  %s1844_s18 = smov %s1427_s19 }
 0x2a6   : > { %s1845_s19 = smov %s1847_s21  ;;  %21 = sbr.rel (!%p19_p1) target bundleno = 11 (0xb), region = 108 }
 0x2ad   :  { %848 = vsyncpa [#allocation3], 1 }
 0x2ae   :  { %850 = vsyncpa [#allocation3 + $0x1], 1 }
 0x2af   :  { %851 = vsyncpa [#allocation6], 1 }
 0x2b0   :  { %853 = vsyncpa [#allocation6 + $0x1], 1 }
 0x2b1   :  { %854 = vsyncpa [#allocation9], 1 }
 0x2b2   :  { %856 = vsyncpa [#allocation9 + $0x1], 1 }
 0x2b3   :  { %857 = vsyncpa [#allocation4], 1 }
 0x2b4   :  { %859 = vsyncpa [#allocation4 + $0x1], 1 }

</bundles_post_ra>
